<compile_context>
chip_gen: v6e
topology: v6e:2x2x1
jax: 0.10.0
libtpu: 0.0.40
codegen_flags: <defaults>
</compile_context>

<pallas_src>
import functools

import jax
import jax.numpy as jnp
from jax.experimental import pallas as pl
from jax.experimental.pallas import tpu as pltpu


def _dice_kernel(logits_ref, label_ref, inter_out, denom_out,
                 inter_acc, denom_acc, *, ignore_index):
    """One (C, T) logits tile + (1, T) label tile of one (batch, split) row."""
    j = pl.program_id(2)

    @pl.when(j == 0)
    def _():
        inter_acc[...] = jnp.zeros_like(inter_acc)
        denom_acc[...] = jnp.zeros_like(denom_acc)

    logits = logits_ref[...].astype(jnp.float32)      # (C, T); bf16 in HBM ok
    label = label_ref[...].astype(jnp.int32)          # (1, T); narrow in HBM ok
    C = logits.shape[0]

    # Numerically stable softmax over the class (sublane) axis.
    m = jnp.max(logits, axis=0, keepdims=True)        # (1, T)  XLU
    e = jnp.exp(logits - m)                           # (C, T)  EUP
    den = jnp.sum(e, axis=0, keepdims=True)           # (1, T)  XLU
    inv = pl.reciprocal(den, approx=True)             # EUP estimate (off the VPU)
    inv = inv * (2.0 - den * inv)                     # 1 Newton step -> ~f32 exact
    prob = e * inv                                    # (C, T)

    valid = label != ignore_index                     # (1, T)
    class_ids = jax.lax.broadcasted_iota(jnp.int32, (C, 1), 0)   # (C, 1) only
    # ignore_index never matches a real class id (asserted in the wrapper), so
    # ignored / padded / OOB-tail pixels contribute nothing here.
    onehot_pos = (label == class_ids) & (class_ids >= 1)          # (C, T)

    # Intersection over classes >= 1: the sublane reduce runs on the XLU, so
    # only a (1, T) VPU add lands on the accumulator.
    inter_acc[...] += jnp.sum(jnp.where(onehot_pos, prob, 0.0),
                              axis=0, keepdims=True)
    # Merged denominator: sum_{c>=1} p_c == 1 - p_0 (softmax identity) and the
    # one-hot label sum over classes >= 1 == [label >= 1]; valid pixels only.
    denom_acc[...] += jnp.where(
        valid, (1.0 - prob[0:1, :]) + (label >= 1).astype(jnp.float32), 0.0)

    @pl.when(j == pl.num_programs(2) - 1)
    def _():
        inter_out[...] = jnp.sum(inter_acc[...], keepdims=True)
        denom_out[...] = jnp.sum(denom_acc[...], keepdims=True)


def _padded_bytes_per_col(rows, dtype):
    """Bytes per lane column of a (rows, T) VMEM buffer incl. sublane padding."""
    itemsize = jnp.dtype(dtype).itemsize
    sub = 8 * (4 // itemsize)                 # 8 (f32/i32), 16 (bf16/i16), 32 (i8)
    rows_p = -(-rows // sub) * sub
    return rows_p * itemsize


def _vmem_budget_bytes():
    """Tile-sizing budget: conservative across v5e/v6e/v7x (64 MiB per-core min)."""
    cap = 64 * 1024 * 1024
    try:
        cap = min(cap, int(pltpu.get_tpu_info().vmem_capacity_bytes))
    except Exception:
        pass
    return min(cap // 2, 24 * 1024 * 1024)


def _pick_tile_hw(hw, desired, bytes_per_col, budget):
    """Largest lane tile (multiple of 128) <= desired that fits the budget.
    Prefers one partial trailing block over shrinking far below `desired`."""
    hw_cap = -(-hw // 128) * 128
    by_budget = (budget // bytes_per_col) // 128 * 128
    t = min(desired, hw_cap, by_budget)
    return max(128, (t // 128) * 128)


def dice_loss(logits_nchw, label_bhw, num_classes, ignore_index=255, eps=0.001,
              tile_hw=65536):
    """logits_nchw: (B, C, H, W) float (f32 or bf16); label_bhw: (B, H, W) int."""
    B, C, H, W = logits_nchw.shape
    assert C == num_classes
    # Intersection masking relies on ignore_index never matching a class id.
    assert ignore_index < 0 or ignore_index >= num_classes
    HW = H * W

    if not jnp.issubdtype(logits_nchw.dtype, jnp.floating):
        logits_nchw = logits_nchw.astype(jnp.float32)

    # Free reshapes only (no HBM transpose, no label dtype pass):
    #   b c h w -> b c (hw);  b h w -> b 1 (hw)
    logits3 = logits_nchw.reshape(B, C, HW)
    label3 = label_bhw.reshape(B, 1, HW)

    # VMEM per lane column: double-buffered inputs + the two (1,T) accumulators,
    # with sublane padding included.
    bytes_per_col = (2 * _padded_bytes_per_col(C, logits3.dtype)
                     + 2 * _padded_bytes_per_col(1, label3.dtype)
                     + 2 * _padded_bytes_per_col(1, jnp.float32))
    budget = _vmem_budget_bytes()
    tile_hw = _pick_tile_hw(HW, tile_hw, bytes_per_col, budget)

    num_tiles = -(-HW // tile_hw)
    # Keep both v7x TensorCores busy when the batch axis alone cannot: split the
    # HW-tile axis into a second parallel grid axis of size S (exact, since
    # per-split partial sums are combined before the dice ratio).
    S = 2 if (B % 2 == 1 and num_tiles >= 2 and num_tiles % 2 == 0) else 1
    tps = num_tiles // S
    hw_total = num_tiles * tile_hw

    # Only labels are padded (cheap); the trailing logits block reads
    # out-of-bounds and those columns are neutralized by the ignore_index labels.
    pad = hw_total - HW
    if pad:
        label3 = jnp.pad(label3, ((0, 0), (0, 0), (0, pad)),
                         constant_values=ignore_index)

    kernel = functools.partial(_dice_kernel, ignore_index=ignore_index)

    part_shape = jax.ShapeDtypeStruct((B * S, 1, 1), jnp.float32)
    part_spec = pl.BlockSpec((None, 1, 1), lambda b, s, j: (b * S + s, 0, 0))

    footprint = bytes_per_col * tile_hw
    vmem_limit = int(min(48 * 1024 * 1024,
                         max(16 * 1024 * 1024, footprint + (8 << 20))))

    inter_p, denom_p = pl.pallas_call(
        kernel,
        out_shape=(part_shape, part_shape),
        grid_spec=pltpu.PrefetchScalarGridSpec(
            num_scalar_prefetch=0,
            grid=(B, S, tps),
            in_specs=[
                pl.BlockSpec((None, C, tile_hw),
                             lambda b, s, j: (b, 0, s * tps + j)),
                pl.BlockSpec((None, 1, tile_hw),
                             lambda b, s, j: (b, 0, s * tps + j)),
                # TODO(synk): on v5e only, consider pipeline_mode=pl.Buffered(3)
                # on the logits spec if profiles show exposed DMA.
            ],
            out_specs=[part_spec, part_spec],
            scratch_shapes=[
                pltpu.VMEM((1, tile_hw), jnp.float32),
                pltpu.VMEM((1, tile_hw), jnp.float32),
            ],
        ),
        # (batch, split) axes are parallel (megacore-shardable); the HW-tile
        # axis is the serial reduction carried in the scratch accumulators.
        compiler_params=pltpu.CompilerParams(
            dimension_semantics=("parallel", "parallel", "arbitrary"),
            vmem_limit_bytes=vmem_limit),
    )(logits3, label3)

    # Combine partial sums *before* forming the dice ratio (exact).
    inter = jnp.sum(inter_p)
    denom = jnp.sum(denom_p)
    return 1.0 - (2.0 * inter + eps) / (denom + eps)


def _reference_dice_loss(logits_nchw, label_bhw, num_classes,
                         ignore_index=255, eps=0.001):
    """Pure-JAX reference mirroring the PyTorch forward (masking == gather)."""
    B, C, H, W = logits_nchw.shape
    logits = jnp.transpose(logits_nchw, (1, 0, 2, 3)).reshape(C, -1)
    logits = logits.astype(jnp.float32)
    label = label_bhw.reshape(-1).astype(jnp.int32)
    valid = (label != ignore_index).astype(jnp.float32)
    prob = jax.nn.softmax(logits, axis=0) * valid[None, :]
    onehot = jax.nn.one_hot(label, C, axis=0) * valid[None, :]
    inter = (onehot[1:, :] * prob[1:, :]).sum()
    return 1.0 - (2.0 * inter + eps) / (prob[1:, :].sum() + onehot[1:, :].sum() + eps)


if __name__ == "__main__":
    num_classes = 4
    ignore_index = 255
    eps = 0.001

    def make_inputs(key, B, H, W, logits_dtype, label_dtype):
        k_logits, k_label, k_ign = jax.random.split(key, 3)
        logits = jax.random.normal(k_logits, (B, num_classes, H, W),
                                   jnp.float32).astype(logits_dtype)
        label = jax.random.randint(k_label, (B, H, W), 0, num_classes, jnp.int32)
        ign = jax.random.bernoulli(k_ign, 0.1, (B, H, W))
        label = jnp.where(ign, ignore_index, label).astype(label_dtype)
        return logits, label

    key = jax.random.PRNGKey(0)
    k1, k2, k3 = jax.random.split(key, 3)

    # 1) Main case: bf16 logits, narrow int16 labels, tile-aligned H*W.
    logits, label = make_inputs(k1, 2, 16, 16, jnp.bfloat16, jnp.int16)
    loss = jax.block_until_ready(
        dice_loss(logits, label, num_classes, ignore_index, eps))
    ref = _reference_dice_loss(logits, label, num_classes, ignore_index, eps)
    assert jnp.allclose(loss, ref, atol=1e-5, rtol=1e-5), (loss, ref)

    # 2) Non-tile-aligned H*W: partial trailing logits block + padded labels.
    logits, label = make_inputs(k2, 1, 17, 13, jnp.float32, jnp.int32)
    loss = jax.block_until_ready(
        dice_loss(logits, label, num_classes, ignore_index, eps))
    ref = _reference_dice_loss(logits, label, num_classes, ignore_index, eps)
    assert jnp.allclose(loss, ref, atol=1e-5, rtol=1e-5), (loss, ref)

    # 3) B=1 with several HW tiles: exercises the S=2 two-TensorCore split.
    logits, label = make_inputs(k3, 1, 16, 32, jnp.bfloat16, jnp.int16)
    loss = jax.block_until_ready(
        dice_loss(logits, label, num_classes, ignore_index, eps, tile_hw=128))
    ref = _reference_dice_loss(logits, label, num_classes, ignore_index, eps)
    assert jnp.allclose(loss, ref, atol=1e-5, rtol=1e-5), (loss, ref)

    print("KERNEL_OK")
</pallas_src>

<mosaic_0001>
module attributes {stable_mosaic.version = 11 : i64} {
  func.func @_dice_kernel(%arg0: i32, %arg1: i32, %arg2: i32, %arg3: memref<1x4x256xbf16, #tpu.memory_space<vmem>>, %arg4: memref<1x1x256xi16, #tpu.memory_space<vmem>>, %arg5: memref<1x1x1xf32, #tpu.memory_space<vmem>>, %arg6: memref<1x1x1xf32, #tpu.memory_space<vmem>>, %arg7: memref<1x256xf32, #tpu.memory_space<vmem>>, %arg8: memref<1x256xf32, #tpu.memory_space<vmem>>) attributes {dimension_semantics = [#tpu.dimension_semantics<parallel>, #tpu.dimension_semantics<parallel>, #tpu.dimension_semantics<arbitrary>], iteration_bounds = array<i64: 2, 1, 1>, scalar_prefetch = 0 : i64, scratch_operands = 2 : i64, tpu.core_type = #tpu.core_type<tc>, window_params = [{transform_indices = @transform_0, window_bounds = array<i64: 1, 4, 256>}, {transform_indices = @transform_1, window_bounds = array<i64: 1, 1, 256>}, {transform_indices = @transform_2, window_bounds = array<i64: 1, 1, 1>}, {transform_indices = @transform_3, window_bounds = array<i64: 1, 1, 1>}]} {
    %c0_i32 = arith.constant 0 : i32
    %0 = arith.cmpi eq, %arg2, %c0_i32 : i32
    %1 = arith.extui %0 : i1 to i32
    %c0_i32_0 = arith.constant 0 : i32
    %2 = arith.cmpi ne, %1, %c0_i32_0 : i32
    scf.if %2 {
      %cst_23 = arith.constant 0.000000e+00 : f32
      %56 = vector.broadcast %cst_23 : f32 to vector<1x256xf32>
      %c0_24 = arith.constant 0 : index
      %c0_25 = arith.constant 0 : index
      %57 = vector.load %arg7[%c0_24, %c0_25] : memref<1x256xf32, #tpu.memory_space<vmem>>, vector<1x256xf32>
      tpu.vector_store %arg7[%c0_24, %c0_25], %56 {strides = array<i32>} : memref<1x256xf32, #tpu.memory_space<vmem>>, vector<1x256xf32>,
      %cst_26 = arith.constant 0.000000e+00 : f32
      %58 = vector.broadcast %cst_26 : f32 to vector<1x256xf32>
      %c0_27 = arith.constant 0 : index
      %c0_28 = arith.constant 0 : index
      %59 = vector.load %arg8[%c0_27, %c0_28] : memref<1x256xf32, #tpu.memory_space<vmem>>, vector<1x256xf32>
      tpu.vector_store %arg8[%c0_27, %c0_28], %58 {strides = array<i32>} : memref<1x256xf32, #tpu.memory_space<vmem>>, vector<1x256xf32>,
    } else {
    }
    %c0 = arith.constant 0 : index
    %c0_1 = arith.constant 0 : index
    %c0_2 = arith.constant 0 : index
    %3 = vector.load %arg3[%c0, %c0_1, %c0_2] : memref<1x4x256xbf16, #tpu.memory_space<vmem>>, vector<1x4x256xbf16>
    %4 = vector.shape_cast %3 : vector<1x4x256xbf16> to vector<4x256xbf16>
    %5 = arith.extf %4 : vector<4x256xbf16> to vector<4x256xf32>
    %c0_3 = arith.constant 0 : index
    %c0_4 = arith.constant 0 : index
    %c0_5 = arith.constant 0 : index
    %6 = vector.load %arg4[%c0_3, %c0_4, %c0_5] : memref<1x1x256xi16, #tpu.memory_space<vmem>>, vector<1x1x256xi16>
    %7 = vector.shape_cast %6 : vector<1x1x256xi16> to vector<1x256xi16>
    %8 = arith.extsi %7 : vector<1x256xi16> to vector<1x256xi32>
    %cst = arith.constant dense<0xFF800000> : vector<256xf32>
    %9 = vector.multi_reduction <maximumf>, %5, %cst [0] : vector<4x256xf32> to vector<256xf32>
    %10 = vector.shape_cast %9 : vector<256xf32> to vector<1x256xf32>
    %11 = vector.broadcast %10 : vector<1x256xf32> to vector<4x256xf32>
    %12 = arith.subf %5, %11 : vector<4x256xf32>
    %13 = math.exp %12 : vector<4x256xf32>
    %cst_6 = arith.constant dense<0.000000e+00> : vector<256xf32>
    %14 = vector.multi_reduction <add>, %13, %cst_6 [0] : vector<4x256xf32> to vector<256xf32>
    %15 = vector.shape_cast %14 : vector<256xf32> to vector<1x256xf32>
    %16 = tpu.reciprocal %15 {approx = true} : vector<1x256xf32> -> vector<1x256xf32>
    %17 = arith.mulf %15, %16 : vector<1x256xf32>
    %cst_7 = arith.constant 2.000000e+00 : f32
    %18 = vector.broadcast %cst_7 : f32 to vector<1x256xf32>
    %19 = arith.subf %18, %17 : vector<1x256xf32>
    %20 = arith.mulf %16, %19 : vector<1x256xf32>
    %21 = vector.broadcast %20 : vector<1x256xf32> to vector<4x256xf32>
    %22 = arith.mulf %13, %21 : vector<4x256xf32>
    %c255_i32 = arith.constant 255 : i32
    %23 = vector.broadcast %c255_i32 : i32 to vector<1x256xi32>
    %24 = arith.cmpi ne, %8, %23 : vector<1x256xi32>
    %25 = tpu.iota {dimensions = array<i32: 0>} : vector<4x1xi32>
    %26 = vector.broadcast %8 : vector<1x256xi32> to vector<4x256xi32>
    %27 = vector.broadcast %25 : vector<4x1xi32> to vector<4x256xi32>
    %28 = arith.cmpi eq, %26, %27 : vector<4x256xi32>
    %c1_i32 = arith.constant 1 : i32
    %29 = vector.broadcast %c1_i32 : i32 to vector<4x1xi32>
    %30 = arith.cmpi sge, %25, %29 : vector<4x1xi32>
    %31 = vector.broadcast %30 : vector<4x1xi1> to vector<4x256xi1>
    %32 = arith.andi %28, %31 : vector<4x256xi1>
    %c0_8 = arith.constant 0 : index
    %c0_9 = arith.constant 0 : index
    %33 = vector.load %arg7[%c0_8, %c0_9] : memref<1x256xf32, #tpu.memory_space<vmem>>, vector<1x256xf32>
    %cst_10 = arith.constant 0.000000e+00 : f32
    %34 = vector.broadcast %cst_10 : f32 to vector<4x256xf32>
    %35 = arith.select %32, %22, %34 : vector<4x256xi1>, vector<4x256xf32>
    %cst_11 = arith.constant dense<0.000000e+00> : vector<256xf32>
    %36 = vector.multi_reduction <add>, %35, %cst_11 [0] : vector<4x256xf32> to vector<256xf32>
    %37 = vector.shape_cast %36 : vector<256xf32> to vector<1x256xf32>
    %38 = arith.addf %33, %37 : vector<1x256xf32>
    %c0_12 = arith.constant 0 : index
    %c0_13 = arith.constant 0 : index
    %39 = vector.load %arg7[%c0_12, %c0_13] : memref<1x256xf32, #tpu.memory_space<vmem>>, vector<1x256xf32>
    tpu.vector_store %arg7[%c0_12, %c0_13], %38 {strides = array<i32>} : memref<1x256xf32, #tpu.memory_space<vmem>>, vector<1x256xf32>,
    %c0_14 = arith.constant 0 : index
    %c0_15 = arith.constant 0 : index
    %40 = vector.load %arg8[%c0_14, %c0_15] : memref<1x256xf32, #tpu.memory_space<vmem>>, vector<1x256xf32>
    %41 = vector.extract_strided_slice %22 {offsets = [0, 0], sizes = [1, 256], strides = [1, 1]} : vector<4x256xf32> to vector<1x256xf32>
    %cst_16 = arith.constant 1.000000e+00 : f32
    %42 = vector.broadcast %cst_16 : f32 to vector<1x256xf32>
    %43 = arith.subf %42, %41 : vector<1x256xf32>
    %c1_i32_17 = arith.constant 1 : i32
    %44 = vector.broadcast %c1_i32_17 : i32 to vector<1x256xi32>
    %45 = arith.cmpi sge, %8, %44 : vector<1x256xi32>
    %46 = arith.extui %45 : vector<1x256xi1> to vector<1x256xi32>
    %47 = arith.sitofp %46 : vector<1x256xi32> to vector<1x256xf32>
    %48 = arith.addf %43, %47 : vector<1x256xf32>
    %cst_18 = arith.constant 0.000000e+00 : f32
    %49 = vector.broadcast %cst_18 : f32 to vector<1x256xf32>
    %50 = arith.select %24, %48, %49 : vector<1x256xi1>, vector<1x256xf32>
    %51 = arith.addf %40, %50 : vector<1x256xf32>
    %c0_19 = arith.constant 0 : index
    %c0_20 = arith.constant 0 : index
    %52 = vector.load %arg8[%c0_19, %c0_20] : memref<1x256xf32, #tpu.memory_space<vmem>>, vector<1x256xf32>
    tpu.vector_store %arg8[%c0_19, %c0_20], %51 {strides = array<i32>} : memref<1x256xf32, #tpu.memory_space<vmem>>, vector<1x256xf32>,
    %c0_i32_21 = arith.constant 0 : i32
    %53 = arith.cmpi eq, %arg2, %c0_i32_21 : i32
    %54 = arith.extui %53 : i1 to i32
    %c0_i32_22 = arith.constant 0 : i32
    %55 = arith.cmpi ne, %54, %c0_i32_22 : i32
    scf.if %55 {
      %c0_23 = arith.constant 0 : index
      %c0_24 = arith.constant 0 : index
      %56 = vector.load %arg7[%c0_23, %c0_24] : memref<1x256xf32, #tpu.memory_space<vmem>>, vector<1x256xf32>
      %57 = vector.shape_cast %56 : vector<1x256xf32> to vector<1x1x256xf32>
      %cst_25 = arith.constant dense<0.000000e+00> : vector<1xf32>
      %58 = vector.multi_reduction <add>, %57, %cst_25 [1, 2] : vector<1x1x256xf32> to vector<1xf32>
      %59 = vector.shape_cast %58 : vector<1xf32> to vector<1x1x1xf32>
      %60 = vector.extract %59[0, 0, 0] : f32 from vector<1x1x1xf32>
      %61 = vector.broadcast %60 : f32 to vector<1x1xf32>
      %c0_26 = arith.constant 0 : index
      %c0_27 = arith.constant 0 : index
      %c0_28 = arith.constant 0 : index
      %62 = vector.load %arg5[%c0_26, %c0_27, %c0_28] : memref<1x1x1xf32, #tpu.memory_space<vmem>>, vector<1x1x1xf32>
      %63 = vector.shape_cast %62 : vector<1x1x1xf32> to vector<1x1xf32>
      %64 = vector.shape_cast %61 : vector<1x1xf32> to vector<1x1x1xf32>
      tpu.vector_store %arg5[%c0_26, %c0_27, %c0_28], %64 {strides = array<i32>} : memref<1x1x1xf32, #tpu.memory_space<vmem>>, vector<1x1x1xf32>,
      %c0_29 = arith.constant 0 : index
      %c0_30 = arith.constant 0 : index
      %65 = vector.load %arg8[%c0_29, %c0_30] : memref<1x256xf32, #tpu.memory_space<vmem>>, vector<1x256xf32>
      %66 = vector.shape_cast %65 : vector<1x256xf32> to vector<1x1x256xf32>
      %cst_31 = arith.constant dense<0.000000e+00> : vector<1xf32>
      %67 = vector.multi_reduction <add>, %66, %cst_31 [1, 2] : vector<1x1x256xf32> to vector<1xf32>
      %68 = vector.shape_cast %67 : vector<1xf32> to vector<1x1x1xf32>
      %69 = vector.extract %68[0, 0, 0] : f32 from vector<1x1x1xf32>
      %70 = vector.broadcast %69 : f32 to vector<1x1xf32>
      %c0_32 = arith.constant 0 : index
      %c0_33 = arith.constant 0 : index
      %c0_34 = arith.constant 0 : index
      %71 = vector.load %arg6[%c0_32, %c0_33, %c0_34] : memref<1x1x1xf32, #tpu.memory_space<vmem>>, vector<1x1x1xf32>
      %72 = vector.shape_cast %71 : vector<1x1x1xf32> to vector<1x1xf32>
      %73 = vector.shape_cast %70 : vector<1x1xf32> to vector<1x1x1xf32>
      tpu.vector_store %arg6[%c0_32, %c0_33, %c0_34], %73 {strides = array<i32>} : memref<1x1x1xf32, #tpu.memory_space<vmem>>, vector<1x1x1xf32>,
    } else {
    }
    return
  }
  func.func @transform_0(%arg0: i32, %arg1: i32, %arg2: i32) -> (i32, i32, i32) {
    %c1_i32 = arith.constant 1 : i32
    %0 = arith.muli %arg1, %c1_i32 : i32
    %1 = arith.addi %0, %arg2 : i32
    %c0_i32 = arith.constant 0 : i32
    %c0_i32_0 = arith.constant 0 : i32
    return %arg0, %c0_i32, %1 : i32, i32, i32
  }
  func.func @transform_1(%arg0: i32, %arg1: i32, %arg2: i32) -> (i32, i32, i32) {
    %c1_i32 = arith.constant 1 : i32
    %0 = arith.muli %arg1, %c1_i32 : i32
    %1 = arith.addi %0, %arg2 : i32
    %c0_i32 = arith.constant 0 : i32
    %c0_i32_0 = arith.constant 0 : i32
    return %arg0, %c0_i32, %1 : i32, i32, i32
  }
  func.func @transform_2(%arg0: i32, %arg1: i32, %arg2: i32) -> (i32, i32, i32) {
    %c1_i32 = arith.constant 1 : i32
    %0 = arith.muli %arg0, %c1_i32 : i32
    %1 = arith.addi %0, %arg1 : i32
    %c0_i32 = arith.constant 0 : i32
    %c0_i32_0 = arith.constant 0 : i32
    %c0_i32_1 = arith.constant 0 : i32
    return %1, %c0_i32, %c0_i32_0 : i32, i32, i32
  }
  func.func @transform_3(%arg0: i32, %arg1: i32, %arg2: i32) -> (i32, i32, i32) {
    %c1_i32 = arith.constant 1 : i32
    %0 = arith.muli %arg0, %c1_i32 : i32
    %1 = arith.addi %0, %arg1 : i32
    %c0_i32 = arith.constant 0 : i32
    %c0_i32_0 = arith.constant 0 : i32
    %c0_i32_1 = arith.constant 0 : i32
    return %1, %c0_i32, %c0_i32_0 : i32, i32, i32
  }
}

</mosaic_0001>

<bundles_post_ra>
// kernel: tpu_custom_call.1
= control target key start
LH: loop header
LB: loop body
LE: loop exit
PB: predicated region body
PF: predicated region fallthrough
CT: control target
= control target key end

     0   :  { %9 = vsyncpa [#allocation5], 0  ;;  %s974_s0 = inlined_call_operand.hbm [shape: bf16[2,4,256], index: 0, kind: input, shape index: {}]   ;;  %s975_s1 = inlined_call_operand.vmem [shape: s16[2,1,256], index: 1, kind: input, shape index: {}]   ;;  %s976_s2 = inlined_call_operand.vmem [shape: f32[2,1,1], index: 2, kind: output, shape index: {0}]   ;;  %s977_s3 = inlined_call_operand.vmem [shape: f32[2,1,1], index: 3, kind: output, shape index: {1}]  }
   0x1   :  { %11 = vsyncpa [#allocation5 + $0x1], 0  ;;  %s812_s12 = smov 0   ;;  %s814_s13 = smov 0  }
   0x2   :  { %s816_s14 = smov 0   ;;  %s818_s15 = smov 0  }
   0x3   :  { %s820_s16 = smov 0   ;;  %s822_s17 = smov 0  }
   0x4 LB: > { %s624_s18 = sadd.s32 4294967295, %s785_s17   ;;  %s36_s19 = sadd.s32 1, %s781_s16  ;;  %s785_s17 = sphi %s822_s17, %s17_s17   ;;  %s781_s16 = sphi %s820_s16, %s987_s16   ;;  %s777_s15 = sphi %s818_s15, %s986_s15   ;;  %s773_s14 = sphi %s816_s14, %s985_s14   ;;  %s769_s13 = sphi %s814_s13, %s984_s13   ;;  %s765_s12 = sphi %s812_s12, %s983_s12  }
   0x5   : > { %p38_p0 = scmp.ge.s32.totalorder %s36_s19, 2  ;;  %s47_s20 = sadd.s32 1, %s773_s14 }
   0x6   : > { %p54_p1 = scmp.ne.s32.totalorder %s773_s14, %s769_s13  ;;  %p55_p2 = scmp.eq.s32.totalorder %s785_s17, 0 }
   0x7   : > { %s989_s19 = smov (%p38_p0, %s36_s19), 0  ;;  %p60_p4 = scmp.ne.s32.totalorder %s769_s13, %s765_s12 }
   0x8   : > { %p848_p3 = por %p55_p2, %p54_p1  ;;  %s42_s22 = ssub.s32 %s781_s16, %s989_s19 }
   0x9   : > { %p61_p5 = scmp.eq.s32.totalorder %s624_s18, 0  ;;  %p45_p6 = scmp.eq.s32.totalorder %s42_s22, 0 }
   0xa   : > { %p648_p8 = scmp.lt.s32.totalorder %s785_s17, 2  ;;  %s170_s25 = sand.u32 1, %s773_s14  }
   0xb   : > { %p855_p7 = por %p61_p5, %p60_p4  ;;  %s637_s26 = sshll.u32 %s781_s16, 6 }
   0xc   : > { %s861_s24 = scalar_select %p45_p6, %s773_s14, %s47_s20  }
   0xd   : > { %s628_s27 = sshll.u32 %s170_s25, 2  ;;  %s183_s30 = scalar_lea.hbm %s974_s0, %s637_s26 }
   0xe   : > { %s174_s4 = scalar_lea.vmem [#allocation4], %s628_s27  ;;  %p870_p9 = pnand %p648_p8, %p848_p3 }
   0xf   : > { %s185_s5 = sshll.u32 %s174_s4, 4  ;;  %p631_p10 = scmp.ge.s32.totalorder %s785_s17, 1  ;;  %s186_s5 = int_to_ptr.vmem [resolvable:$true] %s185_s5 }
  0x10   : > { %p204_p11 = scmp.lt.s32.totalorder %s785_s17, 3  ;;  %s171_s7 = scalar_lea.sflag [#allocation5], %s170_s25 }
  0x11   : > { %p709_p12 = pneg %p870_p9  ;;  %s720_s8 = scalar_lea.vmem %s186_s5, 64 }
  0x12   : > { %p721_p13 = scmp.ne.s32.totalorder %s186_s5, %s720_s8  ;;  %s787_s9 = smov [#allocation4]  }
  0x13   : > { %s725_s10 = sshll.u32 %s787_s9, 4  ;;  %s726_s10 = int_to_ptr.vmem [resolvable:$false] %s725_s10 }
  0x14   : > { %p723_p0 = pnand %p721_p13, %p709_p12  ;;  %s727_s11 = scalar_lea.vmem %s726_s10, 128 }
  0x15   : > { %p728_p2 = scmp.lt.s32.totalorder %s186_s5, %s726_s10  ;;  %p729_p3 = scmp.lt.s32.totalorder %s727_s11, %s720_s8 }
  0x16   : > { %p724_p1 = pneg %p723_p0 }
  0x17   : > { %p730_p4 = por %p729_p3, %p728_p2 }
  0x19   : > { %p731_p5 = pnand %p730_p4, %p724_p1 }
  0x1b   : > { %734 = shalt.err (!%p731_p5)
}
  0x1c   : > { %647 = dma.hbm_to_vmem [thread:$0]  (!%p870_p9), %s183_s30, 64, %s186_s5, %s171_s7  }
  0x1d   : > { %p205_p6 = pnand %p631_p10, %p204_p11 }
  0x1e   : > { %s210_s12 = sand.u32 (!%p205_p6), 1, %s769_s13  }
  0x1f   : > { %208 = sbr.rel (%p205_p6) target bundleno = 357 (0x165), region = 28  ;;  %s632_s18 = sshll.u32 (!%p205_p6), %s210_s12, 2 }
  0x20   : > { %s211_s20 = scalar_lea.sflag (!%p205_p6), [#allocation5], %s210_s12  ;;  %s214_s21 = scalar_lea.vmem (!%p205_p6), [#allocation4], %s632_s18 }
  0x24   : > { %760 = dma.done.wait (%p855_p7), %s211_s20, 64  }
  0x25   : > { %762 = vsyncadd (%p855_p7), %s211_s20, 4294967232  ;;  %p253_p8 = scmp.lt.s32.totalorder %s777_s15, 1  ;;  %v276_v0 = vlaneseq  ;;  %v788_v2 = vmov 572653568   ;;  %v789_v4 = vmov 0.0   ;;  %v282_v7 = vld [vmem:[%s214_s21] sm:$0xf] }
  0x26   : > { %v418_v3 = vunpack.c.l.s4 %v788_v2  ;;  %vm289_vm1 = vcmask 1043456   ;;  %v283_v9 = vunpack.c.l.bf16 %v282_v7  ;;  %v790_v60 = vmov 1983009808  }
  0x27   : > { %s991_s15 = smov (!%p253_p8, %s777_s15), 1  ;;  %vm893_vm0 = vcmp.lt.s32.totalorder %v276_v0, 256  ;;  %v905_v6 = vshrl.u32 %v276_v0, 7  ;;  %v428_v61 = vunpack.c.l.s4 %v790_v60  ;;  %vm462_vm9 = vcmask 1040384  }
  0x28   : > { %280 = vst.msk [vmem:[#allocation2] sm:$0x3] %vm893_vm0, %v789_v4  ;;  %281 = vst.msk [vmem:[#allocation3] sm:$0x3] %vm893_vm0, %v789_v4  ;;  %s633_s22 = sshll.u32 %s991_s15, 1  ;;  %v419_v5 = vunpack.c.0.s8 %v418_v3  ;;  %v287_v12 = vcombine.high %v283_v9, %v283_v9  ;;  %v290_v13 = vsel %vm289_vm1, %v283_v9, -inf  ;;  %s265_s29 = scalar_lea.vmem %s976_s2, %s991_s15 }
  0x29   : > { %s259_s26 = scalar_lea.vmem %s975_s1, %s633_s22  ;;  %v291_v14 = vrot.slane %v290_v13, 4  ;;  %v922_v48 = vsub.s32 0, %v905_v6  ;;  %v350_v49 = vsub.s32 2, %v905_v6  ;;  %vm362_vm4 = vcmp.ge.s32.totalorder %v905_v6, 1  ;;  %s270_s6 = scalar_lea.vmem %s977_s3, %s991_s15 }
  0x2a   : > { %v284_v8 = vld [vmem:[%s259_s26] sm:$0x3]  ;;  %v910_v11 = vsub.s32 %v419_v5, %v905_v6  ;;  %v297_v16 = vsel %vm289_vm1, %v287_v12, -inf  ;;  %v429_v2 = vunpack.c.0.s8 %v428_v61  ;;  %v791_v3 = vmov 1966171168  }
  0x2b   : > { %v907_v10 = vunpack.c.l.b16 %v284_v8  ;;  %v292_v18 = vmax.f32 %v290_v13, %v291_v14  ;;  %v298_v19 = vrot.slane %v297_v16, 4  ;;  %vm476_vm10 = vcmask 0  }
  0x2c   : > { %v432_v8 = vsub.s32 %v429_v2, %v905_v6 }
  0x2d   : > { %vm413_vm2 = vcmp.ge.s32.totalorder %v907_v10, 1  ;;  %v293_v20 = vrot.slane %v292_v18, 2  ;;  %v299_v21 = vmax.f32 %v297_v16, %v298_v19  ;;  %v347_v50 = vrot.slane %v907_v10, %v922_v48 }
  0x2e   : > { %v914_v15 = vsel %vm413_vm2, 1.0, %v789_v4  ;;  %v351_v53 = vrot.slane %v907_v10, %v350_v49  ;;  %v391_v4 = vunpack.c.l.s4 %v791_v3  ;;  %vm341_vm8 = vcmp.ne.s32.totalorder %v907_v10, 255 }
  0x2f   : > { %v423_v17 = vrot.slane %v914_v15, %v910_v11  ;;  %v294_v22 = vmax.f32 %v292_v18, %v293_v20  ;;  %v300_v23 = vrot.slane %v299_v21, 2  ;;  %v355_v57 = vrot.slane %v347_v50, %v922_v48 }
  0x30   : > { %v359_v62 = vrot.slane %v351_v53, %v922_v48  ;;  %v392_v13 = vunpack.c.0.s8 %v391_v4 }
  0x31   : > { %v295_v24 = vrot.slane %v294_v22, 1  ;;  %v301_v25 = vmax.f32 %v299_v21, %v300_v23  ;;  %vm360_vm3 = vcmp.eq.s32.totalorder %v355_v57, %v905_v6 }
  0x32   : > { %vm361_vm5 = vcmp.eq.s32.totalorder %v359_v62, %v905_v6  ;;  %vm365_vm6 = vmand %vm360_vm3, %vm362_vm4 }
  0x33   : > { %v296_v26 = vmax.f32 %v294_v22, %v295_v24  ;;  %v302_v27 = vrot.slane %v301_v25, 1  ;;  %vm366_vm7 = vmand %vm361_vm5, %vm362_vm4  ;;  %v395_v24 = vsub.s32 %v392_v13, %v905_v6 }
  0x35   : > { %v303_v28 = vmax.f32 %v301_v25, %v302_v27  ;;  %v411_v25 = vld [vmem:[#allocation3] sm:$0x3] }
  0x37   : > { %v306_v29 = vcombine.low %v296_v26, %v303_v28 }
  0x39   : > { %v308_v30 = vsub.f32 %v283_v9, %v306_v29 }
  0x3b   : > { %v309_v31 = vmul.f32 1.442695, %v308_v30 }
  0x3d   : > { %701 = vpow2.f32 %v309_v31 }
  0x4a   : > { %v702_v32 = vpop.eup %701 }
  0x4b   : > { %v312_v33 = vcombine.high %v702_v32, %v702_v32  ;;  %v314_v34 = vsel %vm289_vm1, %v702_v32, 0.0 }
  0x4c   : > { %v315_v35 = vrot.slane %v314_v34, 4 }
  0x4d   : > { %v321_v36 = vsel %vm289_vm1, %v312_v33, 0.0 }
  0x4e   : > { %v316_v37 = vadd.f32 %v315_v35, %v314_v34  ;;  %v322_v38 = vrot.slane %v321_v36, 4 }
  0x50   : > { %v317_v39 = vrot.slane %v316_v37, 2  ;;  %v323_v40 = vadd.f32 %v322_v38, %v321_v36  ;;  %v367_v36 = vld [vmem:[#allocation2] sm:$0x3] }
  0x52   : > { %v318_v41 = vadd.f32 %v317_v39, %v316_v37  ;;  %v324_v42 = vrot.slane %v323_v40, 2 }
  0x54   : > { %v319_v43 = vrot.slane %v318_v41, 1  ;;  %v325_v44 = vadd.f32 %v324_v42, %v323_v40  ;;  %v458_v40 = vsub.s32 1, %v905_v6 }
  0x56   : > { %v320_v45 = vadd.f32 %v319_v43, %v318_v41  ;;  %v326_v46 = vrot.slane %v325_v44, 1 }
  0x58   : > { %v327_v47 = vadd.f32 %v326_v46, %v325_v44  ;;  %703 = vrcp.f32 %v320_v45 }
  0x5a   : > { %705 = vrcp.f32 %v327_v47 }
  0x65   : > { %v704_v51 = vpop.eup %703 }
  0x66   : > { %v330_v52 = vmul.f32 %v704_v51, %v320_v45 }
  0x67   : > { %v706_v54 = vpop.eup %705 }
  0x68   : > { %v331_v55 = vmul.f32 %v706_v54, %v327_v47  ;;  %v332_v56 = vsub.f32 2.0, %v330_v52 }
  0x6a   : > { %v333_v58 = vsub.f32 2.0, %v331_v55  ;;  %v334_v59 = vmul.f32 %v704_v51, %v332_v56 }
  0x6c   : > { %v335_v63 = vmul.f32 %v706_v54, %v333_v58 }
  0x6e   : > { %v338_v0 = vcombine.low %v334_v59, %v335_v63 }
  0x70   : > { %v340_v5 = vmul.f32 %v702_v32, %v338_v0 }
  0x72   : > { %v412_v7 = vsub.f32 1.0, %v340_v5  ;;  %v369_v9 = vcombine.high %v340_v5, %v340_v5  ;;  %v371_v12 = vsel %vm365_vm6, %v340_v5, 0.0 }
  0x73   : > { %v373_v14 = vsel %vm289_vm1, %v371_v12, 0.0 }
  0x74   : > { %v425_v16 = vadd.f32 %v423_v17, %v412_v7  ;;  %v372_v18 = vsel %vm366_vm7, %v369_v9, 0.0  ;;  %v374_v19 = vrot.slane %v373_v14, 4 }
  0x75   : > { %v380_v20 = vsel %vm289_vm1, %v372_v18, 0.0 }
  0x76   : > { %v433_v21 = vrot.slane %v425_v16, %v432_v8  ;;  %v375_v22 = vadd.f32 %v374_v19, %v373_v14  ;;  %v381_v23 = vrot.slane %v380_v20, 4 }
  0x78   : > { %v435_v26 = vsel %vm341_vm8, %v433_v21, 0.0  ;;  %v376_v27 = vrot.slane %v375_v22, 2  ;;  %v382_v28 = vadd.f32 %v381_v23, %v380_v20 }
  0x79   : > { %v443_v29 = vrot.slane %v435_v26, %v395_v24 }
  0x7a   : > { %v377_v30 = vadd.f32 %v376_v27, %v375_v22  ;;  %v383_v31 = vrot.slane %v382_v28, 2 }
  0x7b   : > { %v445_v11 = vadd.f32 %v443_v29, %v411_v25 }
  0x7c   : > { %v378_v15 = vrot.slane %v377_v30, 1  ;;  %v384_v17 = vadd.f32 %v383_v31, %v382_v28 }
  0x7d   : > { %446 = vst.msk [vmem:[#allocation3] sm:$0x3] %vm893_vm0, %v445_v11 }
  0x7e   : > { %v379_v10 = vadd.f32 %v378_v15, %v377_v30  ;;  %v385_v32 = vrot.slane %v384_v17, 1 }
  0x80   : > { %v386_v33 = vadd.f32 %v385_v32, %v384_v17 }
  0x82   : > { %v389_v34 = vcombine.low %v379_v10, %v386_v33 }
  0x84   : > { %v396_v35 = vrot.slane %v389_v34, %v395_v24  ;;  %v478_v39 = vld [vmem:[#allocation3] sm:$0x3] }
  0x85   : > { %v483_v41 = vrot.slane %v478_v39, %v922_v48  ;;  %v487_v42 = vrot.slane %v478_v39, %v458_v40 }
  0x86   : > { %v403_v37 = vrot.slane %v396_v35, %v395_v24 }
  0x87   : > { %v490_v49 = vsel %vm462_vm9, %v483_v41, 0.0  ;;  %v491_v50 = vsel %vm462_vm9, %v487_v42, 0.0 }
  0x88   : > { %v405_v38 = vadd.f32 %v403_v37, %v367_v36  ;;  %v492_v52 = vadd.f32 %v491_v50, %v490_v49 }
  0x8a   : > { %410 = vst.msk [vmem:[#allocation2] sm:$0x3] %vm893_vm0, %v405_v38 }
  0x91   : > { %v450_v43 = vld [vmem:[#allocation2] sm:$0x3] }
  0x92   : > { %v455_v44 = vrot.slane %v450_v43, %v922_v48  ;;  %v459_v45 = vrot.slane %v450_v43, %v458_v40 }
  0x94   : > { %v463_v46 = vsel %vm462_vm9, %v455_v44, 0.0  ;;  %v464_v47 = vsel %vm462_vm9, %v459_v45, 0.0 }
  0x95   : > { %v465_v51 = vadd.f32 %v464_v47, %v463_v46 }
  0x97   : > { %466 = vadd.xlane.f32.xlu0 %v465_v51 }
  0x9b   : > { %493 = vadd.xlane.f32.xlu0 %v492_v52 }
 0x120   : > { %v467_v1 = vpop.xlane.xlu0 %466 }
 0x121   : > { %v468_v53 = vrot.slane %v467_v1, 4 }
 0x123   : > { %v469_v6 = vadd.f32 %v468_v53, %v467_v1 }
 0x124   : > { %v494_v54 = vpop.xlane.xlu0 %493 }
 0x125   : > { %v470_v55 = vrot.slane %v469_v6, 2  ;;  %v495_v56 = vrot.slane %v494_v54, 4 }
 0x127   : > { %v496_v57 = vadd.f32 %v495_v56, %v494_v54  ;;  %v471_v58 = vadd.f32 %v470_v55, %v469_v6 }
 0x129   : > { %v497_v48 = vrot.slane %v496_v57, 2  ;;  %v472_v59 = vrot.slane %v471_v58, 1 }
 0x12b   : > { %v498_v60 = vadd.f32 %v497_v48, %v496_v57  ;;  %v473_v61 = vadd.f32 %v472_v59, %v471_v58 }
 0x12d   : > { %638 = vpush %v473_v61  ;;  %v499_v62 = vrot.slane %v498_v60, 1 }
 0x12f   : > { %v500_v63 = vadd.f32 %v499_v62, %v498_v60 }
 0x131   : > { %640 = vpush %v500_v63 }
 0x15e   : > { %s639_s30 = spop %638 }
 0x15f   : > { %v475_v0 = vstv %s639_s30 }
 0x160   : > { %477 = vst.msk [vmem:[%s265_s29] sm:$0x1] %vm476_vm10, %v475_v0 }
 0x162   : > { %s641_s7 = spop %640 }
 0x163   : > { %v502_v2 = vstv %s641_s7 }
 0x164   : > { %503 = vst.msk [vmem:[%s270_s6] sm:$0x1] %vm476_vm10, %v502_v2 }
 0x165 PF: > { %s17_s17 = sadd.s32 1, %s785_s17   ;;  %s983_s12 = smov %s769_s13 }
 0x166   : > { %p14_p7 = scmp.ge.s32.totalorder %s17_s17, 4   ;;  %s984_s13 = smov %s773_s14 }
 0x167   : > { %s985_s14 = smov %s861_s24  ;;  %s986_s15 = smov %s781_s16 }
 0x168   : > { %s987_s16 = smov %s989_s19  ;;  %16 = sbr.rel (!%p14_p7) target bundleno = 4 (0x4), region = 91 }
 0x16d   :  { %539 = vsyncpa [#allocation5], 1 }
 0x16e   :  { %541 = vsyncpa [#allocation5 + $0x1], 1 }

</bundles_post_ra>
